<compile_context>
chip_gen: v7x
topology: tpu7x:2x2x1
jax: 0.10.0
libtpu: 0.0.40
codegen_flags: <defaults>
</compile_context>

<pallas_src>
import functools

import jax
import jax.numpy as jnp
from jax import lax
from jax.experimental import pallas as pl
from jax.experimental.pallas import tpu as pltpu


def _cdiv(a, b):
    return (a + b - 1) // b


def _round_up(x, m):
    return ((x + m - 1) // m) * m


def _vmem_budget_and_limit():
    """Per-kernel working-set budget + scoped-VMEM limit, generation aware."""
    try:
        cap = int(pltpu.get_tpu_info().vmem_capacity_bytes)
    except Exception:
        cap = 64 * 1024 * 1024            # conservative fallback (v7x per-core)
    budget = max(6 << 20, min(32 << 20, cap // 4))
    limit = max(32 << 20, min(96 << 20, (cap * 3) // 4))
    return budget, limit


# --------------------------------------------------------------------------
# Pass 1: partial sums over N of rep (T, D, N) -> (num_chunks, T, D)
# --------------------------------------------------------------------------
def _means_kernel(rep_ref, acc_ref, *, n_valid, tile, inner, need_mask):
    step = pl.program_id(1)

    @pl.when(step == 0)
    def _init():
        acc_ref[...] = jnp.zeros_like(acc_ref)

    x = rep_ref[...].astype(jnp.float32)                    # (T, D, tile)
    if need_mask:
        # Ragged last tile: zero the out-of-range lanes before the
        # cross-lane reduction (select, so stale NaNs cannot leak).
        start = (pl.program_id(0) * inner + step) * tile
        col = lax.broadcasted_iota(jnp.int32, x.shape, 2) + start
        x = jnp.where(col < n_valid, x, 0.0)
    acc_ref[...] += jnp.sum(x, axis=-1)[None, :, :]         # (1, T, D)


# --------------------------------------------------------------------------
# Pass 2: per-sample CE + per-sample triplet-center partial sums (per N-tile)
# --------------------------------------------------------------------------
def _goad_tile_kernel(means_ref, rep_ref, pred_t_ref, labels_ref,
                      ce_ref, tc_ref, *, margin):
    # ---- CrossEntropyLoss (reduction='none') in the lane-dense (C, tn) layout
    pred = pred_t_ref[...].astype(jnp.float32)                          # (C, tn)
    labels = labels_ref[...]                                            # (1, tn)
    c, tn = pred.shape
    mx = jnp.max(pred, axis=0, keepdims=True)                           # (1, tn)
    lse = jnp.log(jnp.sum(jnp.exp(pred - mx), axis=0, keepdims=True)) + mx
    cls = lax.broadcasted_iota(jnp.int32, (c, tn), 0)
    sel = jnp.sum(jnp.where(cls == labels, pred, 0.0), axis=0, keepdims=True)
    ce_ref[...] = lse - sel                                             # (1, tn)

    # ---- triplet-center term ------------------------------------------------
    x_in = rep_ref[...]                                                 # (T, D, tn), rep dtype
    means = means_ref[...]                                              # (T, D) f32
    t, d, _ = x_in.shape

    x = x_in.astype(jnp.float32)
    rep_norm = jnp.sum(x * x, axis=1)                                   # (T, tn)
    # Diagonal distance computed directly (no cancellation when x ~ means[i]).
    dpos = x - means[:, :, None]                                        # (T, D, tn)
    pos = jnp.sum(dpos * dpos, axis=1)                                  # (T, tn)

    # Off-diagonal distances via ||x||^2 + ||m||^2 - 2 x.m; the cross term is
    # a batched MXU matmul (batch = i, contract = d, output lanes = samples).
    means_b = jnp.broadcast_to(means.astype(x_in.dtype)[None], (t, t, d))
    cross = jnp.einsum('ijd,idn->ijn', means_b, x_in,
                       preferred_element_type=jnp.float32,
                       precision=lax.Precision.HIGHEST)                 # (T, T, tn)

    m_norm = jnp.sum(means * means, axis=1, keepdims=True)              # (T, 1), row j
    eye = (lax.broadcasted_iota(jnp.int32, (t, t), 0) ==
           lax.broadcasted_iota(jnp.int32, (t, t), 1))
    # Fold the reference's +1e6*eye diagonal offset into the (i, j) bias so it
    # costs nothing extra.  (Reference uses eye(rep.dtype)*1e6; f32 here.)
    adj = jnp.transpose(m_norm) + jnp.where(eye, jnp.float32(1.0e6),
                                            jnp.float32(0.0))           # (T, T)
    res = rep_norm[:, None, :] + adj[:, :, None] - 2.0 * cross          # (T, T, tn)
    neg = jnp.min(res, axis=1)                                          # (T, tn)

    hinge = jnp.maximum(pos + jnp.float32(margin) - neg, 0.0)           # (T, tn)
    tc_ref[...] = jnp.sum(hinge, axis=0, keepdims=True)                 # (1, tn)


# --------------------------------------------------------------------------
# Wrapper
# --------------------------------------------------------------------------
def goad_loss(rep, pred, labels, alpha=0.1, margin=1.0,
              tile_n=None, means_tile_n=None):
    n, t, d = rep.shape
    c = pred.shape[1]
    itemsize = jnp.dtype(rep.dtype).itemsize

    budget, vmem_limit = _vmem_budget_and_limit()

    # Layout plumbing (one-pass relayouts of small/medium arrays; ideally the
    # producer would already emit rep as (T, D, N)).
    rep_t = jnp.transpose(rep, (1, 2, 0))                    # (T, D, N), N lane-dense
    pred_t = jnp.transpose(pred)                             # (C, N)
    labels_r = labels.astype(jnp.int32).reshape(1, n)        # (1, N)

    # =====================  pass 1: means over N  ===========================
    if means_tile_n is not None:
        tn1 = int(means_tile_n)
    else:
        per_col = 2 * t * d * itemsize + 2 * t * d * 4       # rep tile (db) + f32 copy
        tn1 = max(128, (budget // per_col) // 128 * 128)
    if tn1 >= n:
        tn1 = n                                              # single full block
    nb1 = _cdiv(n, tn1)
    num_chunks = 2 if (nb1 >= 4 and nb1 % 2 == 0) else 1     # one chunk per v7x TC
    inner = nb1 // num_chunks

    partials = pl.pallas_call(
        functools.partial(_means_kernel, n_valid=n, tile=tn1, inner=inner,
                          need_mask=(n % tn1 != 0)),
        out_shape=jax.ShapeDtypeStruct((num_chunks, t, d), jnp.float32),
        grid=(num_chunks, inner),
        in_specs=[pl.BlockSpec((t, d, tn1),
                               lambda ck, i: (0, 0, ck * inner + i))],
        out_specs=pl.BlockSpec((1, t, d), lambda ck, i: (ck, 0, 0)),
        compiler_params=pltpu.CompilerParams(
            dimension_semantics=("parallel", "arbitrary"),
            vmem_limit_bytes=vmem_limit),
    )(rep_t)
    means = jnp.sum(partials, axis=0) * jnp.float32(1.0 / n)             # (T, D)

    # ==========  pass 2: per-sample CE + triplet-center partial sums  =======
    if tile_n is not None:
        tn2 = int(tile_n)
    else:
        per_col = (2 * t * d * itemsize      # rep tile (double-buffered)
                   + 2 * t * d * 4           # f32 copy + diagonal diff
                   + 3 * t * t * 4           # cross / res (+slack)
                   + 4 * c * 4               # pred^T tile (db) + f32 copy
                   + 8 * t * 4               # (T, tn) temporaries
                   + 16)                     # (1, tn) outputs (db)
        tn2 = max(128, (budget // per_col) // 128 * 128)
        # Keep >=4 grid steps when N allows it: DMA/compute overlap and both
        # v7x TensorCores get work from the "parallel" axis.
        tn2 = min(tn2, max(128, _round_up(_cdiv(n, 4), 128)))
    if tn2 >= n:
        tn2 = n
    nb2 = _cdiv(n, tn2)

    ce_row, tc_row = pl.pallas_call(
        functools.partial(_goad_tile_kernel, margin=float(margin)),
        out_shape=(jax.ShapeDtypeStruct((1, n), jnp.float32),
                   jax.ShapeDtypeStruct((1, n), jnp.float32)),
        grid=(nb2,),
        in_specs=[pl.BlockSpec((t, d), lambda i: (0, 0)),            # means (resident)
                  pl.BlockSpec((t, d, tn2), lambda i: (0, 0, i)),    # rep tile
                  pl.BlockSpec((c, tn2), lambda i: (0, i)),          # pred^T tile
                  pl.BlockSpec((1, tn2), lambda i: (0, i))],         # labels tile
        out_specs=(pl.BlockSpec((1, tn2), lambda i: (0, i)),
                   pl.BlockSpec((1, tn2), lambda i: (0, i))),
        compiler_params=pltpu.CompilerParams(
            dimension_semantics=("parallel",),                        # megacore on v7x
            vmem_limit_bytes=vmem_limit),
    )(means, rep_t, pred_t, labels_r)

    # Final tiny combine in plain XLA.
    loss_ce = ce_row[0]                                               # (N,)
    loss_tc = jnp.sum(tc_row[0]) / jnp.float32(n * t)
    return jnp.float32(alpha) * loss_tc + loss_ce


def goad_loss_ref(rep, pred, labels, alpha=0.1, margin=1.0):
    """Pure-JAX reference reproducing the PyTorch semantics exactly."""
    logp = jax.nn.log_softmax(pred, axis=-1)
    loss_ce = -jnp.take_along_axis(logp, labels[:, None], axis=-1)[:, 0]
    means = rep.mean(axis=0, keepdims=True)                  # (1, T, D)
    diff = rep[:, :, None, :] - means[:, None, :, :]         # (N, T, T, D)
    res = (diff ** 2).sum(-1)                                # (N, T, T)
    pos = jnp.diagonal(res, axis1=1, axis2=2)                # (N, T)
    offset = jnp.eye(rep.shape[1], dtype=jnp.float32)[None] * 1.0e6
    neg = (res + offset).min(axis=-1)                        # (N, T)
    loss_tc = jnp.maximum(pos + margin - neg, 0.0).mean()
    return alpha * loss_tc + loss_ce


if __name__ == "__main__":
    # Small shapes consistent with GOAD usage: N samples, T transformations,
    # D-dim representation, C (= T) classification logits.
    N, T, D, C = 8, 8, 32, 8
    k1, k2, k3 = jax.random.split(jax.random.PRNGKey(0), 3)
    rep = jax.random.normal(k1, (N, T, D), dtype=jnp.float32)
    pred = jax.random.normal(k2, (N, C), dtype=jnp.float32)
    labels = jax.random.randint(k3, (N,), 0, C, dtype=jnp.int32)

    out = jax.block_until_ready(goad_loss(rep, pred, labels, alpha=0.1, margin=1.0))
    ref = goad_loss_ref(rep, pred, labels, alpha=0.1, margin=1.0)
    assert out.shape == (N,)
    assert jnp.allclose(out, ref, atol=1e-3, rtol=1e-3), (out, ref)

    # Multi-tile / ragged path: 4 pass-2 tiles (last one partial), 2-chunk
    # "parallel" means reduction with an in-kernel mask on the last tile.
    N2 = 500
    k4, k5, k6 = jax.random.split(jax.random.PRNGKey(1), 3)
    rep2 = jax.random.normal(k4, (N2, T, D), dtype=jnp.float32)
    pred2 = jax.random.normal(k5, (N2, C), dtype=jnp.float32)
    labels2 = jax.random.randint(k6, (N2,), 0, C, dtype=jnp.int32)

    out2 = jax.block_until_ready(
        goad_loss(rep2, pred2, labels2, tile_n=128, means_tile_n=128))
    ref2 = goad_loss_ref(rep2, pred2, labels2)
    assert out2.shape == (N2,)
    assert jnp.allclose(out2, ref2, atol=1e-3, rtol=1e-3), \
        float(jnp.max(jnp.abs(out2 - ref2)))

    print("KERNEL_OK")
</pallas_src>

<mosaic_0001>
module attributes {stable_mosaic.version = 11 : i64} {
  func.func @_means_kernel(%arg0: i32, %arg1: i32, %arg2: memref<8x32x8xf32, #tpu.memory_space<vmem>>, %arg3: memref<1x8x32xf32, #tpu.memory_space<vmem>>) attributes {dimension_semantics = [#tpu.dimension_semantics<parallel>, #tpu.dimension_semantics<arbitrary>], iteration_bounds = array<i64: 1, 1>, scalar_prefetch = 0 : i64, scratch_operands = 0 : i64, tpu.core_type = #tpu.core_type<tc>, window_params = [{transform_indices = @transform_0, window_bounds = array<i64: 8, 32, 8>}, {transform_indices = @transform_1, window_bounds = array<i64: 1, 8, 32>}]} {
    %c0_i32 = arith.constant 0 : i32
    %0 = arith.cmpi eq, %arg1, %c0_i32 : i32
    %1 = arith.extui %0 : i1 to i32
    %c0_i32_0 = arith.constant 0 : i32
    %2 = arith.cmpi ne, %1, %c0_i32_0 : i32
    scf.if %2 {
      %cst_9 = arith.constant 0.000000e+00 : f32
      %9 = vector.broadcast %cst_9 : f32 to vector<1x8x32xf32>
      %c0_10 = arith.constant 0 : index
      %c0_11 = arith.constant 0 : index
      %c0_12 = arith.constant 0 : index
      %10 = vector.load %arg3[%c0_10, %c0_11, %c0_12] : memref<1x8x32xf32, #tpu.memory_space<vmem>>, vector<1x8x32xf32>
      tpu.vector_store %arg3[%c0_10, %c0_11, %c0_12], %9 {strides = array<i32>} : memref<1x8x32xf32, #tpu.memory_space<vmem>>, vector<1x8x32xf32>,
    } else {
    }
    %c0 = arith.constant 0 : index
    %c0_1 = arith.constant 0 : index
    %c0_2 = arith.constant 0 : index
    %3 = vector.load %arg2[%c0, %c0_1, %c0_2] : memref<8x32x8xf32, #tpu.memory_space<vmem>>, vector<8x32x8xf32>
    %c0_3 = arith.constant 0 : index
    %c0_4 = arith.constant 0 : index
    %c0_5 = arith.constant 0 : index
    %4 = vector.load %arg3[%c0_3, %c0_4, %c0_5] : memref<1x8x32xf32, #tpu.memory_space<vmem>>, vector<1x8x32xf32>
    %cst = arith.constant dense<0.000000e+00> : vector<8x32xf32>
    %5 = vector.multi_reduction <add>, %3, %cst [2] : vector<8x32x8xf32> to vector<8x32xf32>
    %6 = vector.shape_cast %5 : vector<8x32xf32> to vector<1x8x32xf32>
    %7 = arith.addf %4, %6 : vector<1x8x32xf32>
    %c0_6 = arith.constant 0 : index
    %c0_7 = arith.constant 0 : index
    %c0_8 = arith.constant 0 : index
    %8 = vector.load %arg3[%c0_6, %c0_7, %c0_8] : memref<1x8x32xf32, #tpu.memory_space<vmem>>, vector<1x8x32xf32>
    tpu.vector_store %arg3[%c0_6, %c0_7, %c0_8], %7 {strides = array<i32>} : memref<1x8x32xf32, #tpu.memory_space<vmem>>, vector<1x8x32xf32>,
    return
  }
  func.func @transform_0(%arg0: i32, %arg1: i32) -> (i32, i32, i32) {
    %c1_i32 = arith.constant 1 : i32
    %0 = arith.muli %arg0, %c1_i32 : i32
    %1 = arith.addi %0, %arg1 : i32
    %c0_i32 = arith.constant 0 : i32
    %c0_i32_0 = arith.constant 0 : i32
    %c0_i32_1 = arith.constant 0 : i32
    return %c0_i32, %c0_i32_0, %1 : i32, i32, i32
  }
  func.func @transform_1(%arg0: i32, %arg1: i32) -> (i32, i32, i32) {
    %c0_i32 = arith.constant 0 : i32
    %c0_i32_0 = arith.constant 0 : i32
    %c0_i32_1 = arith.constant 0 : i32
    return %arg0, %c0_i32, %c0_i32_0 : i32, i32, i32
  }
}

</mosaic_0001>

<bundles_post_ra>
// kernel: tpu_custom_call.1
= control target key start
LH: loop header
LB: loop body
LE: loop exit
PB: predicated region body
PF: predicated region fallthrough
CT: control target
= control target key end

     0   :  { %vm65_vm0 = vcmask 64512   ;;  %s678_s0 = inlined_call_operand.vmem [shape: f32[8,32,8], index: 0, kind: input, shape index: {}]   ;;  %s679_s1 = inlined_call_operand.hbm [shape: f32[1,8,32], index: 1, kind: output, shape index: {}]  }
   0x1   :  { %v36_v0 = vld [vmem:[%s678_s0 + $0x20] sm:$0xff]  ;;  %v37_v2 = vld [vmem:[%s678_s0 + $0x28] sm:$0xff]  ;;  %v38_v8 = vld [vmem:[%s678_s0 + $0x30] sm:$0xff] }
   0x2   :  { %v32_v1 = vld [vmem:[%s678_s0] sm:$0xff]  ;;  %v78_v3 = vsel %vm65_vm0, %v36_v0, 0.0  ;;  %v33_v5 = vld [vmem:[%s678_s0 + $0x8] sm:$0xff]  ;;  %v81_v6 = vsel %vm65_vm0, %v37_v2, 0.0  ;;  %v34_v9 = vld [vmem:[%s678_s0 + $0x10] sm:$0xff]  ;;  %v84_v10 = vsel %vm65_vm0, %v38_v8, 0.0 }
   0x3   :  { %v66_v4 = vsel %vm65_vm0, %v32_v1, 0.0  ;;  %79 = vadd.xlane.f32.xlu1 %v78_v3  ;;  %v69_v7 = vsel %vm65_vm0, %v33_v5, 0.0  ;;  %v72_v11 = vsel %vm65_vm0, %v34_v9, 0.0  ;;  %v41_v12 = vld [vmem:[%s678_s0 + $0x48] sm:$0xff]  ;;  %v40_v13 = vld [vmem:[%s678_s0 + $0x40] sm:$0xff] }
   0x4   :  { %67 = vadd.xlane.f32.xlu0 %v66_v4  ;;  %v93_v14 = vsel %vm65_vm0, %v41_v12, 0.0  ;;  %v90_v15 = vsel %vm65_vm0, %v40_v13, 0.0 }
   0x7   :  { %82 = vadd.xlane.f32.xlu1 %v81_v6 }
   0x8   :  { %70 = vadd.xlane.f32.xlu0 %v69_v7 }
   0xb   :  { %85 = vadd.xlane.f32.xlu1 %v84_v10 }
   0xc   :  { %73 = vadd.xlane.f32.xlu0 %v72_v11 }
   0xd   :  { %6 = vsyncpa [#allocation3], 0  ;;  %v39_v16 = vld [vmem:[%s678_s0 + $0x38] sm:$0xff]  ;;  %v44_v20 = vld [vmem:[%s678_s0 + $0x60] sm:$0xff]  ;;  %vm30_vm1 = vcmask 261120   ;;  %v418_v0 = vmov 0.0  }
   0xe   :  { %v35_v17 = vld [vmem:[%s678_s0 + $0x18] sm:$0xff]  ;;  %v87_v18 = vsel %vm65_vm0, %v39_v16, 0.0  ;;  %v42_v21 = vld [vmem:[%s678_s0 + $0x50] sm:$0xff]  ;;  %v102_v22 = vsel %vm65_vm0, %v44_v20, 0.0  ;;  %v45_v25 = vld [vmem:[%s678_s0 + $0x68] sm:$0xff]  ;;  %31 = vst.msk [vmem:[#allocation2] sm:$0xff] %vm30_vm1, %v418_v0 }
   0xf   :  { %94 = vadd.xlane.f32.xlu1 %v93_v14  ;;  %v75_v19 = vsel %vm65_vm0, %v35_v17, 0.0  ;;  %v96_v23 = vsel %vm65_vm0, %v42_v21, 0.0  ;;  %v43_v24 = vld [vmem:[%s678_s0 + $0x58] sm:$0xff]  ;;  %v105_v27 = vsel %vm65_vm0, %v45_v25, 0.0  ;;  %v48_v28 = vld [vmem:[%s678_s0 + $0x80] sm:$0xff]  ;;  %v46_v29 = vld [vmem:[%s678_s0 + $0x70] sm:$0xff]  ;;  %v194_v17 = vlaneseq }
  0x10   :  { %91 = vadd.xlane.f32.xlu0 %v90_v15  ;;  %v99_v26 = vsel %vm65_vm0, %v43_v24, 0.0  ;;  %v114_v30 = vsel %vm65_vm0, %v48_v28, 0.0  ;;  %v108_v31 = vsel %vm65_vm0, %v46_v29, 0.0  ;;  %v47_v32 = vld [vmem:[%s678_s0 + $0x78] sm:$0xff]  ;;  %v49_v33 = vld [vmem:[%s678_s0 + $0x88] sm:$0xff]  ;;  %v52_v36 = vld [vmem:[%s678_s0 + $0xa0] sm:$0xff] }
  0x11   :  { %v111_v34 = vsel %vm65_vm0, %v47_v32, 0.0  ;;  %v117_v35 = vsel %vm65_vm0, %v49_v33, 0.0  ;;  %v50_v37 = vld [vmem:[%s678_s0 + $0x90] sm:$0xff]  ;;  %v126_v38 = vsel %vm65_vm0, %v52_v36, 0.0  ;;  %v51_v40 = vld [vmem:[%s678_s0 + $0x98] sm:$0xff]  ;;  %v53_v41 = vld [vmem:[%s678_s0 + $0xa8] sm:$0xff] }
  0x12   :  { %v120_v39 = vsel %vm65_vm0, %v50_v37, 0.0  ;;  %v123_v42 = vsel %vm65_vm0, %v51_v40, 0.0  ;;  %v129_v43 = vsel %vm65_vm0, %v53_v41, 0.0  ;;  %v56_v44 = vld [vmem:[%s678_s0 + $0xc0] sm:$0xff]  ;;  %v54_v45 = vld [vmem:[%s678_s0 + $0xb0] sm:$0xff]  ;;  %v55_v48 = vld [vmem:[%s678_s0 + $0xb8] sm:$0xff] }
  0x13   :  { %88 = vadd.xlane.f32.xlu1 %v87_v18  ;;  %v138_v46 = vsel %vm65_vm0, %v56_v44, 0.0  ;;  %v132_v47 = vsel %vm65_vm0, %v54_v45, 0.0  ;;  %v57_v49 = vld [vmem:[%s678_s0 + $0xc8] sm:$0xff]  ;;  %v135_v50 = vsel %vm65_vm0, %v55_v48, 0.0  ;;  %v60_v52 = vld [vmem:[%s678_s0 + $0xe0] sm:$0xff]  ;;  %v58_v53 = vld [vmem:[%s678_s0 + $0xd0] sm:$0xff] }
  0x14   :  { %76 = vadd.xlane.f32.xlu0 %v75_v19  ;;  %v141_v51 = vsel %vm65_vm0, %v57_v49, 0.0  ;;  %v150_v54 = vsel %vm65_vm0, %v60_v52, 0.0  ;;  %v144_v55 = vsel %vm65_vm0, %v58_v53, 0.0  ;;  %v59_v56 = vld [vmem:[%s678_s0 + $0xd8] sm:$0xff]  ;;  %v61_v57 = vld [vmem:[%s678_s0 + $0xe8] sm:$0xff]  ;;  %v62_v60 = vld [vmem:[%s678_s0 + $0xf0] sm:$0xff] }
  0x15   :  { %v147_v58 = vsel %vm65_vm0, %v59_v56, 0.0  ;;  %v153_v59 = vsel %vm65_vm0, %v61_v57, 0.0  ;;  %v63_v61 = vld [vmem:[%s678_s0 + $0xf8] sm:$0xff]  ;;  %v156_v62 = vsel %vm65_vm0, %v62_v60, 0.0  ;;  %v195_v20 = vand.u32 127, %v194_v17  ;;  %s419_s0 = smov [#allocation2]  }
  0x16   :  { %v159_v63 = vsel %vm65_vm0, %v63_v61, 0.0  ;;  %v197_v24 = vshrl.u32 %v194_v17, 7  ;;  %vm205_vm2 = vcmask 130112   ;;  %vm212_vm3 = vcmask 195712   ;;  %s378_s12 = sshll.u32 %s419_s0, 4  ;;  %s379_s12 = int_to_ptr.vmem [resolvable:$true] %s378_s12 }
  0x17   :  { %103 = vadd.xlane.f32.xlu1 %v102_v22  ;;  %v207_v25 = vadd.s32 4294967280, %v195_v20  ;;  %vm219_vm4 = vcmask 261312   ;;  %vm354_vm5 = vcmask 1041409   ;;  %vm356_vm6 = vcmask 1042434   ;;  %s394_s13 = scalar_lea.vmem %s379_s12, 128  ;;  %p399_p1 = scmp.lt.s32.totalorder %s379_s12, %s379_s12 }
  0x18   :  { %97 = vadd.xlane.f32.xlu0 %v96_v23  ;;  %v200_v23 = vadd.s32 4294967288, %v195_v20  ;;  %vm358_vm7 = vcmask 1043459   ;;  %vm360_vm8 = vcmask 1044484   ;;  %vm362_vm9 = vcmask 1045509   ;;  %p395_p0 = scmp.ne.s32.totalorder %s379_s12, %s394_s13  ;;  %p400_p2 = scmp.lt.s32.totalorder %s394_s13, %s394_s13 }
  0x19   :  { %vm364_vm10 = vcmask 1046534   ;;  %vm366_vm11 = vcmask 1047559  }
  0x1a   :  { %v579_v29 = vsub.s32 %v200_v23, %v197_v24  ;;  %p401_p3 = por %p400_p2, %p399_p1 }
  0x1b   :  { %100 = vadd.xlane.f32.xlu1 %v99_v26  ;;  %v214_v26 = vadd.s32 4294967272, %v195_v20 }
  0x1c   :  { %106 = vadd.xlane.f32.xlu0 %v105_v27  ;;  %p402_p4 = pnand %p401_p3, %p395_p0 }
  0x1d   :  { %v585_v32 = vsub.s32 %v214_v26, %v197_v24 }
  0x1f   :  { %115 = vadd.xlane.f32.xlu1 %v114_v30  ;;  %v581_v30 = vsub.s32 %v195_v20, %v197_v24 }
  0x20   :  { %109 = vadd.xlane.f32.xlu0 %v108_v31  ;;  %v583_v31 = vsub.s32 %v207_v25, %v197_v24 }
  0x23   :  { %112 = vadd.xlane.f32.xlu1 %v111_v34 }
  0x24   :  { %118 = vadd.xlane.f32.xlu0 %v117_v35 }
  0x27   :  { %127 = vadd.xlane.f32.xlu1 %v126_v38 }
  0x28   :  { %121 = vadd.xlane.f32.xlu0 %v120_v39 }
  0x2b   :  { %124 = vadd.xlane.f32.xlu1 %v123_v42 }
  0x2c   :  { %130 = vadd.xlane.f32.xlu0 %v129_v43 }
  0x2f   :  { %139 = vadd.xlane.f32.xlu1 %v138_v46 }
  0x30   :  { %133 = vadd.xlane.f32.xlu0 %v132_v47 }
  0x33   :  { %136 = vadd.xlane.f32.xlu1 %v135_v50 }
  0x34   :  { %142 = vadd.xlane.f32.xlu0 %v141_v51 }
  0x37   :  { %151 = vadd.xlane.f32.xlu1 %v150_v54 }
  0x38   :  { %145 = vadd.xlane.f32.xlu0 %v144_v55 }
  0x3b   :  { %148 = vadd.xlane.f32.xlu1 %v147_v58 }
  0x3c   :  { %154 = vadd.xlane.f32.xlu0 %v153_v59 }
  0x3f   :  { %160 = vadd.xlane.f32.xlu1 %v159_v63 }
  0x40   :  { %157 = vadd.xlane.f32.xlu0 %v156_v62 }
  0x90   :  { %v80_v1 = vpop.xlane.xlu1 %79 }
  0x91   :  { %v68_v2 = vpop.xlane.xlu0 %67  ;;  %v224_v37 = vrot.slane %v80_v1, %v581_v30 }
  0x92   :  { %v199_v38 = vrot.slane %v68_v2, %v581_v30 }
  0x94   :  { %v83_v3 = vpop.xlane.xlu1 %82 }
  0x95   :  { %v71_v4 = vpop.xlane.xlu0 %70  ;;  %v228_v35 = vrot.slane %v83_v3, %v579_v29 }
  0x96   :  { %v204_v36 = vrot.slane %v71_v4, %v579_v29 }
  0x97   :  { %v229_v48 = vsel %vm205_vm2, %v228_v35, %v224_v37 }
  0x98   :  { %v86_v5 = vpop.xlane.xlu1 %85  ;;  %v206_v49 = vsel %vm205_vm2, %v204_v36, %v199_v38 }
  0x99   :  { %v74_v6 = vpop.xlane.xlu0 %73  ;;  %v233_v39 = vrot.slane %v86_v5, %v583_v31 }
  0x9a   :  { %v211_v40 = vrot.slane %v74_v6, %v583_v31 }
  0x9b   :  { %v234_v51 = vsel %vm212_vm3, %v233_v39, %v229_v48 }
  0x9c   :  { %v95_v7 = vpop.xlane.xlu1 %94  ;;  %v213_v52 = vsel %vm212_vm3, %v211_v40, %v206_v49 }
  0x9d   :  { %v92_v8 = vpop.xlane.xlu0 %91  ;;  %v247_v41 = vrot.slane %v95_v7, %v579_v29 }
  0x9e   :  { %v243_v42 = vrot.slane %v92_v8, %v581_v30 }
  0xa0   :  { %v89_v9 = vpop.xlane.xlu1 %88  ;;  %v248_v53 = vsel %vm205_vm2, %v247_v41, %v243_v42  ;;  %v64_v41 = vld [vmem:[#allocation2] sm:$0xff] }
  0xa1   :  { %v77_v10 = vpop.xlane.xlu0 %76  ;;  %v238_v43 = vrot.slane %v89_v9, %v585_v32 }
  0xa2   :  { %v218_v44 = vrot.slane %v77_v10, %v585_v32 }
  0xa3   :  { %v239_v54 = vsel %vm219_vm4, %v238_v43, %v234_v51 }
  0xa4   :  { %v559_v11 = vpop.xlane.xlu1 %103  ;;  %v220_v55 = vsel %vm219_vm4, %v218_v44, %v213_v52 }
  0xa5   :  { %v98_v12 = vpop.xlane.xlu0 %97  ;;  %v262_v59 = vrot.slane %v559_v11, %v581_v30 }
  0xa6   :  { %v252_v47 = vrot.slane %v98_v12, %v583_v31 }
  0xa8   :  { %v101_v13 = vpop.xlane.xlu1 %100  ;;  %v253_v60 = vsel %vm212_vm3, %v252_v47, %v248_v53 }
  0xa9   :  { %v561_v14 = vpop.xlane.xlu0 %106  ;;  %v257_v50 = vrot.slane %v101_v13, %v585_v32 }
  0xaa   :  { %v266_v56 = vrot.slane %v561_v14, %v579_v29 }
  0xab   :  { %v258_v63 = vsel %vm219_vm4, %v257_v50, %v253_v60 }
  0xac   :  { %v563_v15 = vpop.xlane.xlu1 %115  ;;  %v267_v7 = vsel %vm205_vm2, %v266_v56, %v262_v59 }
  0xad   :  { %v565_v16 = vpop.xlane.xlu0 %109  ;;  %v281_v3 = vrot.slane %v563_v15, %v581_v30 }
  0xae   :  { %v271_v61 = vrot.slane %v565_v16, %v583_v31 }
  0xb0   :  { %v567_v18 = vpop.xlane.xlu1 %112  ;;  %v272_v13 = vsel %vm212_vm3, %v271_v61, %v267_v7 }
  0xb1   :  { %v569_v19 = vpop.xlane.xlu0 %118  ;;  %v276_v0 = vrot.slane %v567_v18, %v585_v32 }
  0xb2   :  { %v285_v62 = vrot.slane %v569_v19, %v579_v29 }
  0xb3   :  { %v277_v17 = vsel %vm219_vm4, %v276_v0, %v272_v13 }
  0xb4   :  { %v571_v21 = vpop.xlane.xlu1 %127  ;;  %v286_v14 = vsel %vm205_vm2, %v285_v62, %v281_v3 }
  0xb5   :  { %v573_v22 = vpop.xlane.xlu0 %121  ;;  %v300_v8 = vrot.slane %v571_v21, %v581_v30  ;;  %v355_v21 = vsel %vm354_vm5, %v239_v54, %v220_v55 }
  0xb6   :  { %v290_v1 = vrot.slane %v573_v22, %v583_v31  ;;  %v357_v25 = vsel %vm356_vm6, %v258_v63, %v355_v21 }
  0xb8   :  { %v575_v27 = vpop.xlane.xlu1 %124  ;;  %v291_v18 = vsel %vm212_vm3, %v290_v1, %v286_v14 }
  0xb9   :  { %v577_v28 = vpop.xlane.xlu0 %130  ;;  %v295_v4 = vrot.slane %v575_v27, %v585_v32 }
  0xba   :  { %v304_v2 = vrot.slane %v577_v28, %v579_v29 }
  0xbb   :  { %v296_v22 = vsel %vm219_vm4, %v295_v4, %v291_v18 }
  0xbc   :  { %v587_v33 = vpop.xlane.xlu1 %139  ;;  %v305_v19 = vsel %vm205_vm2, %v304_v2, %v300_v8 }
  0xbd   :  { %v589_v34 = vpop.xlane.xlu0 %133  ;;  %v319_v15 = vrot.slane %v587_v33, %v581_v30 }
  0xbe   :  { %v309_v5 = vrot.slane %v589_v34, %v583_v31 }
  0xc0   :  { %v137_v45 = vpop.xlane.xlu1 %136  ;;  %v310_v23 = vsel %vm212_vm3, %v309_v5, %v305_v19 }
  0xc1   :  { %v143_v46 = vpop.xlane.xlu0 %142  ;;  %v314_v9 = vrot.slane %v137_v45, %v585_v32 }
  0xc2   :  { %v323_v6 = vrot.slane %v143_v46, %v579_v29 }
  0xc3   :  { %v315_v26 = vsel %vm219_vm4, %v314_v9, %v310_v23 }
  0xc4   :  { %v152_v57 = vpop.xlane.xlu1 %151  ;;  %v324_v24 = vsel %vm205_vm2, %v323_v6, %v319_v15 }
  0xc5   :  { %v146_v58 = vpop.xlane.xlu0 %145  ;;  %v338_v27 = vrot.slane %v152_v57, %v581_v30 }
  0xc6   :  { %v328_v10 = vrot.slane %v146_v58, %v583_v31 }
  0xc8   :  { %v149_v11 = vpop.xlane.xlu1 %148  ;;  %v329_v28 = vsel %vm212_vm3, %v328_v10, %v324_v24 }
  0xc9   :  { %v155_v12 = vpop.xlane.xlu0 %154  ;;  %v333_v16 = vrot.slane %v149_v11, %v585_v32 }
  0xca   :  { %v342_v20 = vrot.slane %v155_v12, %v579_v29  ;;  %v359_v29 = vsel %vm358_vm7, %v277_v17, %v357_v25 }
  0xcb   :  { %v334_v35 = vsel %vm219_vm4, %v333_v16, %v329_v28  ;;  %v361_v38 = vsel %vm360_vm8, %v296_v22, %v359_v29 }
  0xcc   :  { %v161_v34 = vpop.xlane.xlu1 %160  ;;  %v343_v39 = vsel %vm205_vm2, %v342_v20, %v338_v27  ;;  %v363_v40 = vsel %vm362_vm9, %v315_v26, %v361_v38 }
  0xcd   :  { %v158_v33 = vpop.xlane.xlu0 %157  ;;  %v352_v37 = vrot.slane %v161_v34, %v585_v32  ;;  %v365_v42 = vsel %vm364_vm10, %v334_v35, %v363_v40 }
  0xce   :  { %v347_v36 = vrot.slane %v158_v33, %v583_v31 }
  0xd0   :  { %v348_v30 = vsel %vm212_vm3, %v347_v36, %v343_v39 }
  0xd1   :  { %v353_v43 = vsel %vm219_vm4, %v352_v37, %v348_v30 }
  0xd2   :  { %v367_v44 = vsel %vm366_vm11, %v353_v43, %v365_v42 }
  0xd3   :  { %v369_v31 = vadd.f32 %v367_v44, %v64_v41 }
  0xd5   :  { %371 = vst.msk [vmem:[#allocation2] sm:$0xff] %vm30_vm1, %v369_v31 }
  0xd6   :  { %405 = shalt.err (!%p402_p4)
}
  0xd7   :  { %s406_s16 = scalar_lea.hbm %s679_s1, 128 }
  0xd8   :  { %p407_p5 = scmp.ne.s32.totalorder %s679_s1, %s406_s16  ;;  %p410_p6 = scmp.lt.u32.totalorder %s406_s16, %s679_s1 }
  0xda   :  { %p412_p7 = pnand %p410_p6, %p407_p5 }
  0xdc   :  { %415 = shalt.err (!%p412_p7)
}
  0xdd   :  { %381 = dma.vmem_to_hbm [thread:$0]  %s379_s12, 128, %s679_s1, [#allocation3]  }
  0xde   :  { %416 = dma.done.wait [#allocation3], 128  }
  0xdf   :  { %417 = vsyncadd [#allocation3], 4294967168 }
  0xe0   :  { %385 = vsyncpa [#allocation3], 1 }

</bundles_post_ra>
